<compile_context>
chip_gen: v7x
topology: tpu7x:2x2x1
jax: 0.10.0
libtpu: 0.0.40
codegen_flags: <defaults>
</compile_context>

<pallas_src>
import functools
import math

import jax
import jax.numpy as jnp
from jax.experimental import pallas as pl
from jax.experimental.pallas import tpu as pltpu


def _round_up(x, m):
    return (x + m - 1) // m * m


def avgpool_cls_kernel(x_ref, wrep_ref, b_ref, sel_ref, o_ref, acc_ref, *, inv_s):
    # x_ref   : (rows_tile, s_tile)       flattened (n, c) rows x spatial tile
    # wrep_ref: (rows_tile, classes)      w[c, k] tiled so row r holds channel r % C
    # b_ref   : (1, classes)
    # sel_ref : (bt, rows_tile)           sel[n, r] = 1 iff row r belongs to batch item n
    # o_ref   : (bt, classes)
    # acc_ref : (rows_tile, 1) f32 VMEM scratch (partial spatial sums)
    s_idx = pl.program_id(1)

    @pl.when(s_idx == 0)
    def _():
        acc_ref[...] = jnp.zeros_like(acc_ref)

    # Partial sum over this spatial tile; widen to f32 inside the reduction
    # instead of materializing a full-tile f32 copy of x.
    acc_ref[...] += jnp.sum(x_ref[...], axis=-1, keepdims=True, dtype=jnp.float32)

    @pl.when(s_idx == pl.num_programs(1) - 1)
    def _():
        # TODO(synk): nn.Dropout(0.7) is identity in eval mode; not applied here.
        # contrib[r, k] = mean(row r) * w[r % C, k]
        contrib = (acc_ref[...] * inv_s) * wrep_ref[...]            # (rows_tile, classes)
        # Sum the C channel-rows of each batch item (tiny MXU matmul) + bias.
        out = jnp.dot(sel_ref[...], contrib, preferred_element_type=jnp.float32)
        out = out + b_ref[...]
        o_ref[...] = out.astype(o_ref.dtype)


def avgpool_forward(x, weight, bias):
    """x: (N, C, D, H, W); weight: (classes, C, 1, 1, 1); bias: (classes,)."""
    N, C, D, H, W = x.shape
    classes = weight.shape[0]
    S = D * H * W
    itemsize = jnp.dtype(x.dtype).itemsize

    # ---------------- tile selection ----------------
    # Row tile holds whole batch items (so the classifier matmul is local) and the
    # flattened row count (bt * C) is a multiple of 8 sublanes.
    base_bt = 8 // math.gcd(C, 8)
    if N * C <= 1024:
        bt = _round_up(N, base_bt)          # one row tile spans the whole (padded) batch
    else:
        bt = 8                              # multiple-of-8 batch items per tile (base_bt | 8)
    rows_tile = bt * C
    n_pad = _round_up(N, bt)
    rows_pad = n_pad * C

    # Lane (spatial) tile: multiple of 128, target 512-2048 lanes, bounded so the
    # double-buffered x tile stays well under the scoped-VMEM default (~32 MiB,
    # and comfortably within v7x's 64 MiB physical VMEM).
    vmem_budget_per_buf = 8 * 1024 * 1024
    max_lanes = max(128, (vmem_budget_per_buf // max(1, rows_tile * itemsize)) // 128 * 128)
    s_tile = min(_round_up(S, 128), 2048, max_lanes)
    s_pad = _round_up(S, s_tile)

    # ---------------- operand prep (free layout plumbing) ----------------
    x2 = x.reshape(N * C, S)
    if (rows_pad != N * C) or (s_pad != S):
        # zero-padding is neutral for the sums; padded batch rows are sliced off below.
        x2 = jnp.pad(x2, ((0, rows_pad - N * C), (0, s_pad - S)))

    w2 = weight.reshape(classes, C).T.astype(jnp.float32)       # (C, classes), pre-transposed
    w_rep = jnp.tile(w2, (bt, 1))                               # (rows_tile, classes)
    b2 = bias.reshape(1, classes).astype(jnp.float32)
    # sel[n, r] = 1 iff row r of the tile belongs to batch item n (avoids in-kernel reshape)
    sel = (jnp.arange(rows_tile)[None, :] // C == jnp.arange(bt)[:, None]).astype(jnp.float32)

    grid = (rows_pad // rows_tile, s_pad // s_tile)
    inv_s = 1.0 / float(S)

    kernel = functools.partial(avgpool_cls_kernel, inv_s=inv_s)

    out = pl.pallas_call(
        kernel,
        out_shape=jax.ShapeDtypeStruct((n_pad, classes), x.dtype),
        grid_spec=pltpu.PrefetchScalarGridSpec(
            num_scalar_prefetch=0,
            grid=grid,
            in_specs=[
                pl.BlockSpec((rows_tile, s_tile), lambda i, s: (i, s)),   # x (pipelined)
                pl.BlockSpec((rows_tile, classes), lambda i, s: (0, 0)),  # tiled weight
                pl.BlockSpec((1, classes), lambda i, s: (0, 0)),          # bias
                pl.BlockSpec((bt, rows_tile), lambda i, s: (0, 0)),       # selection matrix
            ],
            out_specs=pl.BlockSpec((bt, classes), lambda i, s: (i, 0)),
            scratch_shapes=[pltpu.VMEM((rows_tile, 1), jnp.float32)],
        ),
        compiler_params=pltpu.CompilerParams(
            dimension_semantics=("parallel", "arbitrary"),
        ),
        cost_estimate=pl.CostEstimate(
            flops=2 * N * C * S + 2 * N * C * classes,
            transcendentals=0,
            bytes_accessed=rows_pad * s_pad * itemsize
            + n_pad * classes * itemsize
            + w_rep.size * 4 + b2.size * 4 + sel.size * 4,
        ),
    )(x2, w_rep, b2, sel)

    # Drop padded batch rows. (PyTorch's .squeeze() is a no-op for N>1, classes>1.)
    return out[:N]


if __name__ == "__main__":
    key = jax.random.PRNGKey(0)
    k_x, k_w, k_b = jax.random.split(key, 3)

    # Small shapes consistent with a Conv3d(inp, classes, (1,1,1)) head.
    N, C, D, H, W = 2, 4, 8, 8, 8
    classes = 6

    x = jax.random.normal(k_x, (N, C, D, H, W), dtype=jnp.float32)
    weight = jax.random.normal(k_w, (classes, C, 1, 1, 1), dtype=jnp.float32) * 0.1
    bias = jax.random.normal(k_b, (classes,), dtype=jnp.float32) * 0.1

    out = jax.block_until_ready(avgpool_forward(x, weight, bias))

    # Pure-JAX reference of the PyTorch forward (dropout in eval mode = identity).
    ref = jnp.mean(x, axis=(2, 3, 4))                               # (N, C)
    ref = ref @ weight.reshape(classes, C).T + bias[None, :]        # (N, classes)

    assert out.shape == (N, classes), out.shape
    assert jnp.allclose(out, ref, atol=1e-5, rtol=1e-5), (out, ref)
    print("KERNEL_OK")
</pallas_src>

<mosaic_0001>
module attributes {stable_mosaic.version = 11 : i64} {
  func.func @avgpool_cls_kernel(%arg0: i32, %arg1: i32, %arg2: memref<8x512xf32, #tpu.memory_space<vmem>>, %arg3: memref<8x6xf32, #tpu.memory_space<vmem>>, %arg4: memref<1x6xf32, #tpu.memory_space<vmem>>, %arg5: memref<2x8xf32, #tpu.memory_space<vmem>>, %arg6: memref<2x6xf32, #tpu.memory_space<vmem>>, %arg7: memref<8x1xf32, #tpu.memory_space<vmem>>) attributes {dimension_semantics = [#tpu.dimension_semantics<parallel>, #tpu.dimension_semantics<arbitrary>], iteration_bounds = array<i64: 1, 1>, scalar_prefetch = 0 : i64, scratch_operands = 1 : i64, tpu.core_type = #tpu.core_type<tc>, window_params = [{transform_indices = @transform_0, window_bounds = array<i64: 8, 512>}, {pipeline_mode = #tpu.pipeline_mode<synchronous>, transform_indices = @transform_1, window_bounds = array<i64: 8, 6>}, {pipeline_mode = #tpu.pipeline_mode<synchronous>, transform_indices = @transform_2, window_bounds = array<i64: 1, 6>}, {pipeline_mode = #tpu.pipeline_mode<synchronous>, transform_indices = @transform_3, window_bounds = array<i64: 2, 8>}, {transform_indices = @transform_4, window_bounds = array<i64: 2, 6>}]} {
    %c0_i32 = arith.constant 0 : i32
    %0 = arith.cmpi eq, %arg1, %c0_i32 : i32
    %1 = arith.extui %0 : i1 to i32
    %c0_i32_0 = arith.constant 0 : i32
    %2 = arith.cmpi ne, %1, %c0_i32_0 : i32
    scf.if %2 {
      %cst_8 = arith.constant 0.000000e+00 : f32
      %12 = vector.broadcast %cst_8 : f32 to vector<8x1xf32>
      %c0_9 = arith.constant 0 : index
      %c0_10 = arith.constant 0 : index
      %13 = vector.load %arg7[%c0_9, %c0_10] : memref<8x1xf32, #tpu.memory_space<vmem>>, vector<8x1xf32>
      tpu.vector_store %arg7[%c0_9, %c0_10], %12 {strides = array<i32>} : memref<8x1xf32, #tpu.memory_space<vmem>>, vector<8x1xf32>,
    } else {
    }
    %c0 = arith.constant 0 : index
    %c0_1 = arith.constant 0 : index
    %3 = vector.load %arg7[%c0, %c0_1] : memref<8x1xf32, #tpu.memory_space<vmem>>, vector<8x1xf32>
    %c0_2 = arith.constant 0 : index
    %c0_3 = arith.constant 0 : index
    %4 = vector.load %arg2[%c0_2, %c0_3] : memref<8x512xf32, #tpu.memory_space<vmem>>, vector<8x512xf32>
    %cst = arith.constant dense<0.000000e+00> : vector<8xf32>
    %5 = vector.multi_reduction <add>, %4, %cst [1] : vector<8x512xf32> to vector<8xf32>
    %6 = vector.shape_cast %5 : vector<8xf32> to vector<8x1xf32>
    %7 = arith.addf %3, %6 : vector<8x1xf32>
    %c0_4 = arith.constant 0 : index
    %c0_5 = arith.constant 0 : index
    %8 = vector.load %arg7[%c0_4, %c0_5] : memref<8x1xf32, #tpu.memory_space<vmem>>, vector<8x1xf32>
    tpu.vector_store %arg7[%c0_4, %c0_5], %7 {strides = array<i32>} : memref<8x1xf32, #tpu.memory_space<vmem>>, vector<8x1xf32>,
    %c0_i32_6 = arith.constant 0 : i32
    %9 = arith.cmpi eq, %arg1, %c0_i32_6 : i32
    %10 = arith.extui %9 : i1 to i32
    %c0_i32_7 = arith.constant 0 : i32
    %11 = arith.cmpi ne, %10, %c0_i32_7 : i32
    scf.if %11 {
      %c0_8 = arith.constant 0 : index
      %c0_9 = arith.constant 0 : index
      %12 = vector.load %arg7[%c0_8, %c0_9] : memref<8x1xf32, #tpu.memory_space<vmem>>, vector<8x1xf32>
      %cst_10 = arith.constant 0.001953125 : f32
      %13 = vector.broadcast %cst_10 : f32 to vector<8x1xf32>
      %14 = arith.mulf %12, %13 : vector<8x1xf32>
      %c0_11 = arith.constant 0 : index
      %c0_12 = arith.constant 0 : index
      %15 = vector.load %arg3[%c0_11, %c0_12] : memref<8x6xf32, #tpu.memory_space<vmem>>, vector<8x6xf32>
      %16 = vector.broadcast %14 : vector<8x1xf32> to vector<8x6xf32>
      %17 = arith.mulf %16, %15 : vector<8x6xf32>
      %c0_13 = arith.constant 0 : index
      %c0_14 = arith.constant 0 : index
      %18 = vector.load %arg5[%c0_13, %c0_14] : memref<2x8xf32, #tpu.memory_space<vmem>>, vector<2x8xf32>
      %cst_15 = arith.constant dense<0.000000e+00> : vector<2x6xf32>
      %19 = tpu.matmul %18, %17, %cst_15 {dimension_numbers = #tpu.dot_dimension_numbers<[1], [0], [0], [1], [0, 0, 1, 1], [], []>} : vector<2x8xf32>, vector<8x6xf32>, vector<2x6xf32> -> vector<2x6xf32>
      %c0_16 = arith.constant 0 : index
      %c0_17 = arith.constant 0 : index
      %20 = vector.load %arg4[%c0_16, %c0_17] : memref<1x6xf32, #tpu.memory_space<vmem>>, vector<1x6xf32>
      %21 = vector.broadcast %20 : vector<1x6xf32> to vector<2x6xf32>
      %22 = arith.addf %19, %21 : vector<2x6xf32>
      %c0_18 = arith.constant 0 : index
      %c0_19 = arith.constant 0 : index
      %23 = vector.load %arg6[%c0_18, %c0_19] : memref<2x6xf32, #tpu.memory_space<vmem>>, vector<2x6xf32>
      tpu.vector_store %arg6[%c0_18, %c0_19], %22 {strides = array<i32>} : memref<2x6xf32, #tpu.memory_space<vmem>>, vector<2x6xf32>,
    } else {
    }
    return
  }
  func.func @transform_0(%arg0: i32, %arg1: i32) -> (i32, i32) {
    %c0_i32 = arith.constant 0 : i32
    return %arg0, %arg1 : i32, i32
  }
  func.func @transform_1(%arg0: i32, %arg1: i32) -> (i32, i32) {
    %c0_i32 = arith.constant 0 : i32
    %c0_i32_0 = arith.constant 0 : i32
    %c0_i32_1 = arith.constant 0 : i32
    return %c0_i32, %c0_i32_0 : i32, i32
  }
  func.func @transform_2(%arg0: i32, %arg1: i32) -> (i32, i32) {
    %c0_i32 = arith.constant 0 : i32
    %c0_i32_0 = arith.constant 0 : i32
    %c0_i32_1 = arith.constant 0 : i32
    return %c0_i32, %c0_i32_0 : i32, i32
  }
  func.func @transform_3(%arg0: i32, %arg1: i32) -> (i32, i32) {
    %c0_i32 = arith.constant 0 : i32
    %c0_i32_0 = arith.constant 0 : i32
    %c0_i32_1 = arith.constant 0 : i32
    return %c0_i32, %c0_i32_0 : i32, i32
  }
  func.func @transform_4(%arg0: i32, %arg1: i32) -> (i32, i32) {
    %c0_i32 = arith.constant 0 : i32
    %c0_i32_0 = arith.constant 0 : i32
    return %arg0, %c0_i32 : i32, i32
  }
}

</mosaic_0001>

<bundles_post_ra>
// kernel: tpu_custom_call.1
= control target key start
LH: loop header
LB: loop body
LE: loop exit
PB: predicated region body
PF: predicated region fallthrough
CT: control target
= control target key end

     0   :  { %9 = vsyncpa [#allocation4], 0  ;;  %s336_s0 = inlined_call_operand.hbm [shape: f32[8,512], index: 0, kind: input, shape index: {}]   ;;  %s337_s1 = inlined_call_operand.hbm [shape: f32[8,6], index: 1, kind: input, shape index: {}]   ;;  %s338_s2 = inlined_call_operand.vmem [shape: f32[1,6], index: 2, kind: input, shape index: {}]   ;;  %s339_s3 = inlined_call_operand.vmem [shape: f32[2,8], index: 3, kind: input, shape index: {}]   ;;  %s340_s4 = inlined_call_operand.hbm [shape: f32[2,6], index: 4, kind: output, shape index: {}]  }
   0x1   :  { %10 = vsyncpa [#allocation7], 0 }
   0x2   :  { %11 = vsyncpa [#allocation5], 0  ;;  %s261_s15 = smov [#allocation3]   ;;  %s262_s17 = smov [#allocation6]  }
   0x3   :  { %s18_s16 = sshll.u32 %s261_s15, 4  ;;  %s28_s18 = sshll.u32 %s262_s17, 4  ;;  %s19_s16 = int_to_ptr.vmem [resolvable:$true] %s18_s16  ;;  %s29_s18 = int_to_ptr.vmem [resolvable:$true] %s28_s18 }
   0x4   :  { %s189_s21 = scalar_lea.hbm %s336_s0, 512 }
   0x5   :  { %p190_p0 = scmp.ne.s32.totalorder %s336_s0, %s189_s21  ;;  %p193_p1 = scmp.lt.u32.totalorder %s189_s21, %s336_s0 }
   0x7   :  { %p195_p2 = pnand %p193_p1, %p190_p0 }
   0x9   :  { %198 = shalt.err (!%p195_p2)
}
   0xa   :  { %s199_s26 = scalar_lea.vmem %s19_s16, 512  ;;  %p204_p4 = scmp.lt.s32.totalorder %s19_s16, %s19_s16 }
   0xb   :  { %p200_p3 = scmp.ne.s32.totalorder %s19_s16, %s199_s26  ;;  %p205_p5 = scmp.lt.s32.totalorder %s199_s26, %s199_s26 }
   0xd   :  { %p206_p6 = por %p205_p5, %p204_p4 }
   0xf   :  { %p207_p7 = pnand %p206_p6, %p200_p3 }
  0x11   :  { %210 = shalt.err (!%p207_p7)
}
  0x12   :  { %21 = dma.hbm_to_vmem [thread:$0]  %s336_s0, 512, %s19_s16, [#allocation4]  }
  0x13   :  { %s211_s5 = scalar_lea.hbm %s337_s1, 128 }
  0x14   :  { %p212_p8 = scmp.ne.s32.totalorder %s337_s1, %s211_s5  ;;  %p215_p9 = scmp.lt.u32.totalorder %s211_s5, %s337_s1 }
  0x16   :  { %p217_p10 = pnand %p215_p9, %p212_p8 }
  0x18   :  { %220 = shalt.err (!%p217_p10)
}
  0x19   :  { %s221_s10 = scalar_lea.vmem %s29_s18, 128  ;;  %p226_p12 = scmp.lt.s32.totalorder %s29_s18, %s29_s18 }
  0x1a   :  { %p222_p11 = scmp.ne.s32.totalorder %s29_s18, %s221_s10  ;;  %p227_p13 = scmp.lt.s32.totalorder %s221_s10, %s221_s10 }
  0x1c   :  { %p228_p0 = por %p227_p13, %p226_p12 }
  0x1e   :  { %p229_p1 = pnand %p228_p0, %p222_p11 }
  0x20   :  { %232 = shalt.err (!%p229_p1)
}
  0x21   :  { %31 = dma.hbm_to_vmem [thread:$0]  %s337_s1, 128, %s29_s18, [#allocation7]  }
  0x22   :  { %255 = dma.done.wait [#allocation4], 512  }
  0x23   :  { %256 = vsyncadd [#allocation4], 4294966784 }
  0x24   :  { %257 = dma.done.wait [#allocation7], 128  }
  0x25   :  { %258 = vsyncadd [#allocation7], 4294967168  ;;  %vm46_vm0 = vcmask 7168   ;;  %v263_v0 = vmov 0.0   ;;  %v49_v1 = vld [vmem:[#allocation3] sm:$0xff]  ;;  %v50_v2 = vld [vmem:[#allocation3 + $0x8] sm:$0xff] }
  0x26   :  { %47 = vst.msk [vmem:[#allocation2] sm:$0xff] %vm46_vm0, %v263_v0  ;;  %177 = vmatprep.subr.mxu0 %v263_v0  ;;  %v51_v3 = vld [vmem:[#allocation3 + $0x10] sm:$0xff]  ;;  %v53_v4 = vadd.f32 %v50_v2, %v49_v1  ;;  %v52_v5 = vld [vmem:[#allocation3 + $0x18] sm:$0xff]  ;;  %v264_v8 = vmov 0   ;;  %vm265_vm1 = vmmov 0   ;;  %v66_v14 = vld [vmem:[#allocation6] sm:$0xff] }
  0x27   :  { %188 = vset.pattern.permute.xlu0 %v264_v8  ;;  %179 = vmatprep.mubr.msk.f32.mxu0 %vm265_vm1, %v263_v0  ;;  %v73_v17 = vld [vmem:[%s339_s3] sm:$0x3]  ;;  %vm81_vm2 = vcmask 64512   ;;  %s266_s15 = smov [#allocation8]   ;;  %vm155_vm3 = vcmask 41984  }
  0x28   :  { %v54_v6 = vadd.f32 %v53_v4, %v51_v3  ;;  %v173_v18 = vld [vmem:[%s338_s2] ss:$0 sm:$0xff]  ;;  %s163_s16 = sshll.u32 %s266_s15, 4  ;;  %s164_s16 = int_to_ptr.vmem [resolvable:$true] %s163_s16 }
  0x29   :  { %s233_s17 = scalar_lea.vmem %s164_s16, 32  ;;  %p238_p3 = scmp.lt.s32.totalorder %s164_s16, %s164_s16 }
  0x2a   :  { %v55_v7 = vadd.f32 %v54_v6, %v52_v5  ;;  %p234_p2 = scmp.ne.s32.totalorder %s164_s16, %s233_s17  ;;  %p239_p4 = scmp.lt.s32.totalorder %s233_s17, %s233_s17 }
  0x2c   :  { %56 = vadd.xlane.f32.xlu0 %v55_v7  ;;  %p240_p5 = por %p239_p4, %p238_p3 }
  0x2d   :  { %v48_v9 = vld [vmem:[#allocation2] sm:$0xff] }
  0x2e   :  { %p241_p6 = pnand %p240_p5, %p234_p2 }
  0xb9   :  { %v57_v10 = vpop.xlane.xlu0 %56 }
  0xba   :  { %v58_v11 = vadd.f32 %v57_v10, %v48_v9 }
  0xbc   :  { %60 = vst.msk [vmem:[#allocation2] sm:$0xff] %vm46_vm0, %v58_v11 }
  0xc3   :  { %v64_v12 = vld [vmem:[#allocation2] sm:$0xff] }
  0xc4   :  { %v65_v13 = vmul.f32 0.001953125, %v64_v12 }
  0xc6   :  { %69 = vperm.xlu0 %188, %v65_v13  }
 0x145   :  { %v70_v15 = vpop.permute.xlu0 %69 }
 0x146   :  { %v72_v16 = vmul.f32 %v70_v15, %v66_v14 }
 0x148   :  { %178 = vmatpush3.msra.mxu0 %v72_v16 }
 0x149   :  { %180 = vmatmul.mubr.msk.f32.vlgmr.msra.gmra.mrb[0].mxu0 %vm81_vm2, %v73_v17 }
 0x21c   :  { %v151_v19 = vpop.f32.mrb[0].mxu0 }
 0x21d   :  { %v152_v20 = vadd.f32 %v173_v18, %v151_v19  ;;  %v181_v21 = vpop.f32.mrb[1].mxu0 }
 0x21f   :  { %156 = vst.msk [vmem:[#allocation8] sm:$0x3] %vm155_vm3, %v152_v20 }
 0x220   :  { %244 = shalt.err (!%p241_p6)
}
 0x221   :  { %s245_s19 = scalar_lea.hbm %s340_s4, 32 }
 0x222   :  { %p246_p7 = scmp.ne.s32.totalorder %s340_s4, %s245_s19  ;;  %p249_p8 = scmp.lt.u32.totalorder %s245_s19, %s340_s4 }
 0x224   :  { %p251_p9 = pnand %p249_p8, %p246_p7 }
 0x226   :  { %254 = shalt.err (!%p251_p9)
}
 0x227   :  { %166 = dma.vmem_to_hbm [thread:$0]  %s164_s16, 32, %s340_s4, [#allocation5]  }
 0x228   :  { %259 = dma.done.wait [#allocation5], 32  }
 0x229   :  { %260 = vsyncadd [#allocation5], 4294967264 }
 0x22a   :  { %170 = vsyncpa [#allocation4], 1 }
 0x22b   :  { %171 = vsyncpa [#allocation7], 1 }
 0x22c   :  { %172 = vsyncpa [#allocation5], 1 }

</bundles_post_ra>
